<compile_context>
chip_gen: v7x
topology: tpu7x:2x2x1
jax: 0.10.0
libtpu: 0.0.40
codegen_flags: <defaults>
</compile_context>

<pallas_src>
import jax
import jax.numpy as jnp
from jax.experimental import pallas as pl
from jax.experimental.pallas import tpu as pltpu


def _round_up(x, m):
    return ((x + m - 1) // m) * m


def decoder_kernel(x_ref, w1_ref, b1_ref, w2_ref, b2_ref, w3_ref, b3_ref, o_ref):
    # Entire 3-layer MLP hot path in one kernel: 3 MXU matmuls (f32 accumulate)
    # + VPU bias-add / ReLU on VMEM-resident, 128-lane-padded tiles.
    x = x_ref[...]
    h1 = jnp.dot(x, w1_ref[...], preferred_element_type=jnp.float32) + b1_ref[...]
    h1 = jnp.maximum(h1, 0.0).astype(w2_ref.dtype)
    h2 = jnp.dot(h1, w2_ref[...], preferred_element_type=jnp.float32) + b2_ref[...]
    h2 = jnp.maximum(h2, 0.0).astype(w3_ref.dtype)
    h3 = jnp.dot(h2, w3_ref[...], preferred_element_type=jnp.float32) + b3_ref[...]
    o_ref[...] = jnp.maximum(h3, 0.0).astype(o_ref.dtype)


def decoder_forward(x, params, *, block_b=512, compute_dtype=None):
    """x: (B, D_in + 3*theta). params: dict of transposed weights/biases.

    block_b: rows per grid step (sweep 512..2048 for large B).
    compute_dtype: e.g. jnp.bfloat16 to halve x/weight HBM traffic on v6e/v7x;
                   None keeps the input dtype (f32). Accumulation is always f32.
    """
    B, D0 = x.shape
    w1, b1 = params["w1"], params["b1"]   # (D0, H1), (1, H1)
    w2, b2 = params["w2"], params["b2"]   # (H1, H2), (1, H2)
    w3, b3 = params["w3"], params["b3"]   # (H2, Dout), (1, Dout)
    H1, H2, Dout = w1.shape[1], w2.shape[1], w3.shape[1]

    # ---- Feature padding to 128 lanes (lane-dense loads/stores, full vregs).
    D0p, H1p, H2p, Doutp = (_round_up(d, 128) for d in (D0, H1, H2, Dout))

    in_dtype = compute_dtype if compute_dtype is not None else x.dtype
    w1p = jnp.pad(w1, ((0, D0p - D0), (0, H1p - H1))).astype(in_dtype)
    w2p = jnp.pad(w2, ((0, H1p - H1), (0, H2p - H2))).astype(in_dtype)
    w3p = jnp.pad(w3, ((0, H2p - H2), (0, Doutp - Dout))).astype(in_dtype)
    # Biases stay f32 (added to the f32 MXU accumulator).
    b1p = jnp.pad(b1, ((0, 0), (0, H1p - H1))).astype(jnp.float32)
    b2p = jnp.pad(b2, ((0, 0), (0, H2p - H2))).astype(jnp.float32)
    b3p = jnp.pad(b3, ((0, 0), (0, Doutp - Dout))).astype(jnp.float32)

    # ---- Batch tiling: multiple grid steps for pipelining, VMEM-safe tile cap.
    block_b = max(8, min(block_b, 4096))          # cap for v7x 64 MiB VMEM
    block_b = min(block_b, _round_up(B, 8))       # don't exceed (padded) batch
    block_b = _round_up(block_b, 8)               # sublane alignment
    B_pad = _round_up(B, block_b)
    xp = jnp.pad(x, ((0, B_pad - B), (0, D0p - D0))).astype(in_dtype)

    grid = (B_pad // block_b,)

    out = pl.pallas_call(
        decoder_kernel,
        out_shape=jax.ShapeDtypeStruct((B_pad, Doutp), jnp.float32),
        grid_spec=pl.GridSpec(
            grid=grid,
            in_specs=[
                pl.BlockSpec((block_b, D0p), lambda i: (i, 0)),
                # Weights / biases: resident (same block every grid step).
                pl.BlockSpec((D0p, H1p), lambda i: (0, 0)),
                pl.BlockSpec((1, H1p), lambda i: (0, 0)),
                pl.BlockSpec((H1p, H2p), lambda i: (0, 0)),
                pl.BlockSpec((1, H2p), lambda i: (0, 0)),
                pl.BlockSpec((H2p, Doutp), lambda i: (0, 0)),
                pl.BlockSpec((1, Doutp), lambda i: (0, 0)),
            ],
            out_specs=pl.BlockSpec((block_b, Doutp), lambda i: (i, 0)),
        ),
        compiler_params=pltpu.CompilerParams(
            dimension_semantics=("parallel",),   # megacore splits batch tiles
        ),
    )(xp, w1p, b1p, w2p, b2p, w3p, b3p)

    # Strip batch + lane padding.
    return out[:B, :Dout].astype(x.dtype)


def init_decoder_params(key, d_in, theta, dtype=jnp.float32):
    """Deterministic init mimicking nn.Linear's U(-1/sqrt(fan_in), +1/sqrt(fan_in)).
    Weights are stored transposed: (in_features, out_features)."""
    dims = [d_in + 3 * theta, d_in + 2 * theta, d_in + 1 * theta, d_in]
    params = {}
    for li, (fin, fout) in enumerate(zip(dims[:-1], dims[1:]), start=1):
        key, kw, kb = jax.random.split(key, 3)
        bound = 1.0 / (fin ** 0.5)
        params[f"w{li}"] = jax.random.uniform(
            kw, (fin, fout), dtype=dtype, minval=-bound, maxval=bound)
        params[f"b{li}"] = jax.random.uniform(
            kb, (1, fout), dtype=dtype, minval=-bound, maxval=bound)
    return params


def decoder_reference(x, params):
    """Pure-JAX reference for correctness checking."""
    h = jnp.maximum(x @ params["w1"] + params["b1"], 0.0)
    h = jnp.maximum(h @ params["w2"] + params["b2"], 0.0)
    h = h @ params["w3"] + params["b3"]
    return jnp.maximum(h, 0.0)


if __name__ == "__main__":
    D_IN = 32
    THETA = 8

    key = jax.random.PRNGKey(0)
    key, kx1, kx2 = jax.random.split(key, 3)
    params = init_decoder_params(key, D_IN, THETA)

    # 1) Small batch (B=8), single grid step, f32.
    x1 = jax.random.normal(kx1, (8, D_IN + 3 * THETA), dtype=jnp.float32)
    y1 = jax.block_until_ready(decoder_forward(x1, params))
    y1_ref = decoder_reference(x1, params)
    assert y1.shape == (8, D_IN)
    assert jnp.allclose(y1, y1_ref, atol=1e-5, rtol=1e-5), "mismatch vs reference (B=8)"

    # 2) Non-divisible batch (B=200) with block_b=64 -> 4 pipelined grid steps.
    x2 = jax.random.normal(kx2, (200, D_IN + 3 * THETA), dtype=jnp.float32)
    y2 = jax.block_until_ready(decoder_forward(x2, params, block_b=64))
    y2_ref = decoder_reference(x2, params)
    assert y2.shape == (200, D_IN)
    assert jnp.allclose(y2, y2_ref, atol=1e-5, rtol=1e-5), "mismatch vs reference (B=200)"

    # 3) bf16 compute path (v6e/v7x HBM-bandwidth optimization); looser tolerance.
    y3 = jax.block_until_ready(
        decoder_forward(x2, params, block_b=64, compute_dtype=jnp.bfloat16))
    assert jnp.allclose(y3, y2_ref, atol=5e-2, rtol=5e-2), "mismatch vs reference (bf16)"

    print("KERNEL_OK")
</pallas_src>

<mosaic_0001>
module attributes {stable_mosaic.version = 11 : i64} {
  func.func @decoder_kernel(%arg0: i32, %arg1: memref<8x128xf32, #tpu.memory_space<vmem>>, %arg2: memref<128x128xf32, #tpu.memory_space<vmem>>, %arg3: memref<1x128xf32, #tpu.memory_space<vmem>>, %arg4: memref<128x128xf32, #tpu.memory_space<vmem>>, %arg5: memref<1x128xf32, #tpu.memory_space<vmem>>, %arg6: memref<128x128xf32, #tpu.memory_space<vmem>>, %arg7: memref<1x128xf32, #tpu.memory_space<vmem>>, %arg8: memref<8x128xf32, #tpu.memory_space<vmem>>) attributes {dimension_semantics = [#tpu.dimension_semantics<parallel>], iteration_bounds = array<i64: 1>, scalar_prefetch = 0 : i64, scratch_operands = 0 : i64, tpu.core_type = #tpu.core_type<tc>, window_params = [{transform_indices = @transform_0, window_bounds = array<i64: 8, 128>}, {pipeline_mode = #tpu.pipeline_mode<synchronous>, transform_indices = @transform_1, window_bounds = array<i64: 128, 128>}, {pipeline_mode = #tpu.pipeline_mode<synchronous>, transform_indices = @transform_2, window_bounds = array<i64: 1, 128>}, {pipeline_mode = #tpu.pipeline_mode<synchronous>, transform_indices = @transform_3, window_bounds = array<i64: 128, 128>}, {pipeline_mode = #tpu.pipeline_mode<synchronous>, transform_indices = @transform_4, window_bounds = array<i64: 1, 128>}, {pipeline_mode = #tpu.pipeline_mode<synchronous>, transform_indices = @transform_5, window_bounds = array<i64: 128, 128>}, {pipeline_mode = #tpu.pipeline_mode<synchronous>, transform_indices = @transform_6, window_bounds = array<i64: 1, 128>}, {transform_indices = @transform_7, window_bounds = array<i64: 8, 128>}]} {
    %c0 = arith.constant 0 : index
    %c0_0 = arith.constant 0 : index
    %0 = vector.load %arg1[%c0, %c0_0] : memref<8x128xf32, #tpu.memory_space<vmem>>, vector<8x128xf32>
    %c0_1 = arith.constant 0 : index
    %c0_2 = arith.constant 0 : index
    %1 = vector.load %arg2[%c0_1, %c0_2] : memref<128x128xf32, #tpu.memory_space<vmem>>, vector<128x128xf32>
    %cst = arith.constant dense<0.000000e+00> : vector<8x128xf32>
    %2 = tpu.matmul %0, %1, %cst {dimension_numbers = #tpu.dot_dimension_numbers<[1], [0], [0], [1], [0, 0, 1, 1], [], []>} : vector<8x128xf32>, vector<128x128xf32>, vector<8x128xf32> -> vector<8x128xf32>
    %c0_3 = arith.constant 0 : index
    %c0_4 = arith.constant 0 : index
    %3 = vector.load %arg3[%c0_3, %c0_4] : memref<1x128xf32, #tpu.memory_space<vmem>>, vector<1x128xf32>
    %4 = vector.broadcast %3 : vector<1x128xf32> to vector<8x128xf32>
    %5 = arith.addf %2, %4 : vector<8x128xf32>
    %cst_5 = arith.constant 0.000000e+00 : f32
    %6 = vector.broadcast %cst_5 : f32 to vector<8x128xf32>
    %7 = arith.maximumf %5, %6 : vector<8x128xf32>
    %c0_6 = arith.constant 0 : index
    %c0_7 = arith.constant 0 : index
    %8 = vector.load %arg4[%c0_6, %c0_7] : memref<128x128xf32, #tpu.memory_space<vmem>>, vector<128x128xf32>
    %cst_8 = arith.constant dense<0.000000e+00> : vector<8x128xf32>
    %9 = tpu.matmul %7, %8, %cst_8 {dimension_numbers = #tpu.dot_dimension_numbers<[1], [0], [0], [1], [0, 0, 1, 1], [], []>} : vector<8x128xf32>, vector<128x128xf32>, vector<8x128xf32> -> vector<8x128xf32>
    %c0_9 = arith.constant 0 : index
    %c0_10 = arith.constant 0 : index
    %10 = vector.load %arg5[%c0_9, %c0_10] : memref<1x128xf32, #tpu.memory_space<vmem>>, vector<1x128xf32>
    %11 = vector.broadcast %10 : vector<1x128xf32> to vector<8x128xf32>
    %12 = arith.addf %9, %11 : vector<8x128xf32>
    %cst_11 = arith.constant 0.000000e+00 : f32
    %13 = vector.broadcast %cst_11 : f32 to vector<8x128xf32>
    %14 = arith.maximumf %12, %13 : vector<8x128xf32>
    %c0_12 = arith.constant 0 : index
    %c0_13 = arith.constant 0 : index
    %15 = vector.load %arg6[%c0_12, %c0_13] : memref<128x128xf32, #tpu.memory_space<vmem>>, vector<128x128xf32>
    %cst_14 = arith.constant dense<0.000000e+00> : vector<8x128xf32>
    %16 = tpu.matmul %14, %15, %cst_14 {dimension_numbers = #tpu.dot_dimension_numbers<[1], [0], [0], [1], [0, 0, 1, 1], [], []>} : vector<8x128xf32>, vector<128x128xf32>, vector<8x128xf32> -> vector<8x128xf32>
    %c0_15 = arith.constant 0 : index
    %c0_16 = arith.constant 0 : index
    %17 = vector.load %arg7[%c0_15, %c0_16] : memref<1x128xf32, #tpu.memory_space<vmem>>, vector<1x128xf32>
    %18 = vector.broadcast %17 : vector<1x128xf32> to vector<8x128xf32>
    %19 = arith.addf %16, %18 : vector<8x128xf32>
    %cst_17 = arith.constant 0.000000e+00 : f32
    %20 = vector.broadcast %cst_17 : f32 to vector<8x128xf32>
    %21 = arith.maximumf %19, %20 : vector<8x128xf32>
    %c0_18 = arith.constant 0 : index
    %c0_19 = arith.constant 0 : index
    %22 = vector.load %arg8[%c0_18, %c0_19] : memref<8x128xf32, #tpu.memory_space<vmem>>, vector<8x128xf32>
    tpu.vector_store %arg8[%c0_18, %c0_19], %21 {strides = array<i32>} : memref<8x128xf32, #tpu.memory_space<vmem>>, vector<8x128xf32>,
    return
  }
  func.func @transform_0(%arg0: i32) -> (i32, i32) {
    %c0_i32 = arith.constant 0 : i32
    %c0_i32_0 = arith.constant 0 : i32
    return %arg0, %c0_i32 : i32, i32
  }
  func.func @transform_1(%arg0: i32) -> (i32, i32) {
    %c0_i32 = arith.constant 0 : i32
    %c0_i32_0 = arith.constant 0 : i32
    %c0_i32_1 = arith.constant 0 : i32
    return %c0_i32, %c0_i32_0 : i32, i32
  }
  func.func @transform_2(%arg0: i32) -> (i32, i32) {
    %c0_i32 = arith.constant 0 : i32
    %c0_i32_0 = arith.constant 0 : i32
    %c0_i32_1 = arith.constant 0 : i32
    return %c0_i32, %c0_i32_0 : i32, i32
  }
  func.func @transform_3(%arg0: i32) -> (i32, i32) {
    %c0_i32 = arith.constant 0 : i32
    %c0_i32_0 = arith.constant 0 : i32
    %c0_i32_1 = arith.constant 0 : i32
    return %c0_i32, %c0_i32_0 : i32, i32
  }
  func.func @transform_4(%arg0: i32) -> (i32, i32) {
    %c0_i32 = arith.constant 0 : i32
    %c0_i32_0 = arith.constant 0 : i32
    %c0_i32_1 = arith.constant 0 : i32
    return %c0_i32, %c0_i32_0 : i32, i32
  }
  func.func @transform_5(%arg0: i32) -> (i32, i32) {
    %c0_i32 = arith.constant 0 : i32
    %c0_i32_0 = arith.constant 0 : i32
    %c0_i32_1 = arith.constant 0 : i32
    return %c0_i32, %c0_i32_0 : i32, i32
  }
  func.func @transform_6(%arg0: i32) -> (i32, i32) {
    %c0_i32 = arith.constant 0 : i32
    %c0_i32_0 = arith.constant 0 : i32
    %c0_i32_1 = arith.constant 0 : i32
    return %c0_i32, %c0_i32_0 : i32, i32
  }
  func.func @transform_7(%arg0: i32) -> (i32, i32) {
    %c0_i32 = arith.constant 0 : i32
    %c0_i32_0 = arith.constant 0 : i32
    return %arg0, %c0_i32 : i32, i32
  }
}

</mosaic_0001>

<bundles_post_ra>
// kernel: tpu_custom_call.1
= control target key start
LH: loop header
LB: loop body
LE: loop exit
PB: predicated region body
PF: predicated region fallthrough
CT: control target
= control target key end

     0   :  { %12 = vsyncpa [#allocation3], 0  ;;  %s898_s0 = inlined_call_operand.hbm [shape: f32[8,128], index: 0, kind: input, shape index: {}]   ;;  %s899_s1 = inlined_call_operand.hbm [shape: f32[128,128], index: 1, kind: input, shape index: {}]   ;;  %s900_s2 = inlined_call_operand.vmem [shape: f32[1,128], index: 2, kind: input, shape index: {}]   ;;  %s901_s3 = inlined_call_operand.hbm [shape: f32[128,128], index: 3, kind: input, shape index: {}]   ;;  %s902_s4 = inlined_call_operand.vmem [shape: f32[1,128], index: 4, kind: input, shape index: {}]   ;;  %s903_s5 = inlined_call_operand.hbm [shape: f32[128,128], index: 5, kind: input, shape index: {}]   ;;  %s904_s6 = inlined_call_operand.vmem [shape: f32[1,128], index: 6, kind: input, shape index: {}]   ;;  %s905_s7 = inlined_call_operand.hbm [shape: f32[8,128], index: 7, kind: output, shape index: {}]  }
   0x1   :  { %13 = vsyncpa [#allocation6], 0 }
   0x2   :  { %14 = vsyncpa [#allocation9], 0 }
   0x3   :  { %15 = vsyncpa [#allocation4], 0  ;;  %s740_s24 = smov [#allocation5]   ;;  %s622_s28 = scalar_lea.hbm %s899_s1, 2048 }
   0x4   :  { %s31_s25 = sshll.u32 %s740_s24, 4  ;;  %p623_p0 = scmp.ne.s32.totalorder %s899_s1, %s622_s28  ;;  %s32_s25 = int_to_ptr.vmem [resolvable:$true] %s31_s25 }
   0x5   :  { %p626_p1 = scmp.lt.u32.totalorder %s622_s28, %s899_s1 }
   0x7   :  { %p628_p2 = pnand %p626_p1, %p623_p0 }
   0x9   :  { %631 = shalt.err (!%p628_p2)
}
   0xa   :  { %s632_s10 = scalar_lea.vmem %s32_s25, 2048  ;;  %p637_p4 = scmp.lt.s32.totalorder %s32_s25, %s32_s25 }
   0xb   :  { %p633_p3 = scmp.ne.s32.totalorder %s32_s25, %s632_s10  ;;  %p638_p5 = scmp.lt.s32.totalorder %s632_s10, %s632_s10 }
   0xd   :  { %p639_p6 = por %p638_p5, %p637_p4 }
   0xf   :  { %p640_p7 = pnand %p639_p6, %p633_p3 }
  0x11   :  { %643 = shalt.err (!%p640_p7)
}
  0x12   :  { %s741_s11 = smov 128   ;;  %s742_s12 = smov 8  }
  0x13   :  { %37 = dma.hbm_to_vmem [thread:$0]  %s899_s1, 2048, %s32_s25, [#allocation6], %s741_s11, %s741_s11, %s742_s12  }
  0x14   :  { %s743_s15 = smov [#allocation2]   ;;  %s744_s17 = smov [#allocation7]  }
  0x15   :  { %s22_s16 = sshll.u32 %s743_s15, 4  ;;  %s45_s18 = sshll.u32 %s744_s17, 4  ;;  %s23_s16 = int_to_ptr.vmem [resolvable:$true] %s22_s16  ;;  %s46_s18 = int_to_ptr.vmem [resolvable:$true] %s45_s18 }
  0x16   :  { %s644_s21 = scalar_lea.hbm %s898_s0, 128 }
  0x17   :  { %p645_p8 = scmp.ne.s32.totalorder %s898_s0, %s644_s21  ;;  %p648_p9 = scmp.lt.u32.totalorder %s644_s21, %s898_s0 }
  0x19   :  { %p650_p10 = pnand %p648_p9, %p645_p8 }
  0x1b   :  { %653 = shalt.err (!%p650_p10)
}
  0x1c   :  { %s654_s1 = scalar_lea.vmem %s23_s16, 128  ;;  %p659_p12 = scmp.lt.s32.totalorder %s23_s16, %s23_s16 }
  0x1d   :  { %p655_p11 = scmp.ne.s32.totalorder %s23_s16, %s654_s1  ;;  %p660_p13 = scmp.lt.s32.totalorder %s654_s1, %s654_s1 }
  0x1f   :  { %p661_p0 = por %p660_p13, %p659_p12 }
  0x21   :  { %p662_p1 = pnand %p661_p0, %p655_p11 }
  0x23   :  { %665 = shalt.err (!%p662_p1)
}
  0x24   :  { %25 = dma.hbm_to_vmem [thread:$0]  %s898_s0, 128, %s23_s16, [#allocation3]  }
  0x25   :  { %s666_s30 = scalar_lea.hbm %s901_s3, 2048 }
  0x26   :  { %p667_p2 = scmp.ne.s32.totalorder %s901_s3, %s666_s30  ;;  %p670_p3 = scmp.lt.u32.totalorder %s666_s30, %s901_s3 }
  0x28   :  { %p672_p4 = pnand %p670_p3, %p667_p2 }
  0x2a   :  { %675 = shalt.err (!%p672_p4)
}
  0x2b   :  { %s676_s14 = scalar_lea.vmem %s46_s18, 2048  ;;  %p681_p6 = scmp.lt.s32.totalorder %s46_s18, %s46_s18 }
  0x2c   :  { %p677_p5 = scmp.ne.s32.totalorder %s46_s18, %s676_s14  ;;  %p682_p7 = scmp.lt.s32.totalorder %s676_s14, %s676_s14 }
  0x2e   :  { %p683_p8 = por %p682_p7, %p681_p6 }
  0x30   :  { %p684_p9 = pnand %p683_p8, %p677_p5 }
  0x32   :  { %687 = shalt.err (!%p684_p9)
}
  0x33   :  { %51 = dma.hbm_to_vmem [thread:$0]  %s901_s3, 2048, %s46_s18, [#allocation6], %s741_s11, %s741_s11, %s742_s12  }
  0x34   :  { %s745_s16 = smov [#allocation8]   ;;  %s688_s21 = scalar_lea.hbm %s903_s5, 2048 }
  0x35   :  { %s59_s17 = sshll.u32 %s745_s16, 4  ;;  %p689_p10 = scmp.ne.s32.totalorder %s903_s5, %s688_s21  ;;  %s60_s17 = int_to_ptr.vmem [resolvable:$true] %s59_s17 }
  0x36   :  { %p692_p11 = scmp.lt.u32.totalorder %s688_s21, %s903_s5 }
  0x38   :  { %p694_p12 = pnand %p692_p11, %p689_p10 }
  0x3a   :  { %697 = shalt.err (!%p694_p12)
}
  0x3b   :  { %s698_s1 = scalar_lea.vmem %s60_s17, 2048  ;;  %p703_p0 = scmp.lt.s32.totalorder %s60_s17, %s60_s17 }
  0x3c   :  { %p699_p13 = scmp.ne.s32.totalorder %s60_s17, %s698_s1  ;;  %p704_p1 = scmp.lt.s32.totalorder %s698_s1, %s698_s1 }
  0x3e   :  { %p705_p2 = por %p704_p1, %p703_p0 }
  0x40   :  { %p706_p3 = pnand %p705_p2, %p699_p13 }
  0x42   :  { %709 = shalt.err (!%p706_p3)
}
  0x43   :  { %65 = dma.hbm_to_vmem [thread:$0]  %s903_s5, 2048, %s60_s17, [#allocation9], %s741_s11, %s741_s11, %s742_s12  }
  0x44   :  { %732 = dma.done.wait [#allocation3], 128  }
  0x45   :  { %733 = vsyncadd [#allocation3], 4294967168 }
  0x46   :  { %734 = dma.done.wait [#allocation6], 4096  }
  0x47   :  { %735 = vsyncadd [#allocation6], 4294963200 }
  0x48   :  { %736 = dma.done.wait [#allocation9], 2048  }
  0x49   :  { %737 = vsyncadd [#allocation9], 4294965248  ;;  %v746_v0 = vmov 0.0|0.0   ;;  %vm747_vm0 = vmmov 0   ;;  %v748_v1 = vmov 0.0   ;;  %v81_v2 = vld [vmem:[#allocation5] sm:$0xff] }
  0x4a   :  { %540 = vmatprep.subr.bf16.mxu0 %v746_v0  ;;  %467 = vmatprep.mubr.msk.f32.mxu0 %vm747_vm0, %v748_v1  ;;  %v82_v3 = vld [vmem:[#allocation5 + $0x8] sm:$0xff]  ;;  %v83_v4 = vld [vmem:[#allocation5 + $0x10] sm:$0xff]  ;;  %v84_v6 = vld [vmem:[#allocation5 + $0x18] sm:$0xff]  ;;  %s749_s28 = smov [#allocation10]  }
  0x4b   :  { %564 = vmatprep.subr.bf16.mxu1 %v746_v0  ;;  %502 = vmatprep.mubr.msk.f32.mxu1 %vm747_vm0, %v748_v1  ;;  %v541_v5 = vpack.c.bf16 %v82_v3, %v81_v2  ;;  %v544_v7 = vpack.c.bf16 %v84_v6, %v83_v4  ;;  %v85_v8 = vld [vmem:[#allocation5 + $0x20] sm:$0xff]  ;;  %v86_v9 = vld [vmem:[#allocation5 + $0x28] sm:$0xff]  ;;  %v177_v12 = vld [vmem:[#allocation7 + $0x10] sm:$0xff]  ;;  %s370_s29 = sshll.u32 %s749_s28, 4  ;;  %s371_s29 = int_to_ptr.vmem [resolvable:$true] %s370_s29 }
  0x4c   :  { %v175_v10 = vld [vmem:[#allocation7] sm:$0xff]  ;;  %v176_v11 = vld [vmem:[#allocation7 + $0x8] sm:$0xff]  ;;  %v178_v13 = vld [vmem:[#allocation7 + $0x18] sm:$0xff]  ;;  %v547_v14 = vpack.c.bf16 %v86_v9, %v85_v8  ;;  %s710_s30 = scalar_lea.vmem %s371_s29, 128  ;;  %p715_p5 = scmp.lt.s32.totalorder %s371_s29, %s371_s29 }
  0x4d   :  { %542 = vmatpush3.bf16.msra.mxu0 %v541_v5  ;;  %v565_v15 = vpack.c.bf16 %v176_v11, %v175_v10  ;;  %v87_v16 = vld [vmem:[#allocation5 + $0x30] sm:$0xff]  ;;  %v88_v17 = vld [vmem:[#allocation5 + $0x38] sm:$0xff]  ;;  %v568_v18 = vpack.c.bf16 %v178_v13, %v177_v12  ;;  %v179_v19 = vld [vmem:[#allocation7 + $0x20] sm:$0xff]  ;;  %p711_p4 = scmp.ne.s32.totalorder %s371_s29, %s710_s30  ;;  %p716_p6 = scmp.lt.s32.totalorder %s710_s30, %s710_s30 }
  0x4e   :  { %543 = vmatprep.subr.bf16.mxu0 %v746_v0  ;;  %v180_v20 = vld [vmem:[#allocation7 + $0x28] sm:$0xff]  ;;  %v550_v21 = vpack.c.bf16 %v88_v17, %v87_v16  ;;  %v89_v22 = vld [vmem:[#allocation5 + $0x40] sm:$0xff]  ;;  %v181_v25 = vld [vmem:[#allocation7 + $0x30] sm:$0xff] }
  0x4f   :  { %566 = vmatpush3.bf16.msra.mxu1 %v565_v15  ;;  %v90_v23 = vld [vmem:[#allocation5 + $0x48] sm:$0xff]  ;;  %v571_v24 = vpack.c.bf16 %v180_v20, %v179_v19  ;;  %v182_v26 = vld [vmem:[#allocation7 + $0x38] sm:$0xff]  ;;  %v91_v28 = vld [vmem:[#allocation5 + $0x50] sm:$0xff]  ;;  %p717_p7 = por %p716_p6, %p715_p5 }
  0x50   :  { %567 = vmatprep.subr.bf16.mxu1 %v746_v0  ;;  %v553_v27 = vpack.c.bf16 %v90_v23, %v89_v22  ;;  %v92_v29 = vld [vmem:[#allocation5 + $0x58] sm:$0xff]  ;;  %v574_v30 = vpack.c.bf16 %v182_v26, %v181_v25  ;;  %v183_v31 = vld [vmem:[#allocation7 + $0x40] sm:$0xff]  ;;  %v184_v32 = vld [vmem:[#allocation7 + $0x48] sm:$0xff] }
  0x51   :  { %545 = vmatpush3.bf16.msra.mxu0 %v544_v7  ;;  %v556_v33 = vpack.c.bf16 %v92_v29, %v91_v28  ;;  %v93_v34 = vld [vmem:[#allocation5 + $0x60] sm:$0xff]  ;;  %v94_v35 = vld [vmem:[#allocation5 + $0x68] sm:$0xff]  ;;  %v577_v36 = vpack.c.bf16 %v184_v32, %v183_v31  ;;  %v185_v37 = vld [vmem:[#allocation7 + $0x50] sm:$0xff]  ;;  %p718_p8 = pnand %p717_p7, %p711_p4 }
  0x52   :  { %546 = vmatprep.subr.bf16.mxu0 %v746_v0  ;;  %v186_v38 = vld [vmem:[#allocation7 + $0x58] sm:$0xff]  ;;  %v559_v39 = vpack.c.bf16 %v94_v35, %v93_v34  ;;  %v95_v40 = vld [vmem:[#allocation5 + $0x70] sm:$0xff]  ;;  %v187_v43 = vld [vmem:[#allocation7 + $0x60] sm:$0xff] }
  0x53   :  { %569 = vmatpush3.bf16.msra.mxu1 %v568_v18  ;;  %v96_v41 = vld [vmem:[#allocation5 + $0x78] sm:$0xff]  ;;  %v580_v42 = vpack.c.bf16 %v186_v38, %v185_v37  ;;  %v188_v44 = vld [vmem:[#allocation7 + $0x68] sm:$0xff]  ;;  %v189_v48 = vld [vmem:[#allocation7 + $0x70] sm:$0xff] }
  0x54   :  { %570 = vmatprep.subr.bf16.mxu1 %v746_v0  ;;  %v562_v45 = vpack.c.bf16 %v96_v41, %v95_v40  ;;  %v583_v46 = vpack.c.bf16 %v188_v44, %v187_v43  ;;  %v80_v47 = vld [vmem:[#allocation2] sm:$0xff]  ;;  %v269_v51 = vld [vmem:[#allocation8] sm:$0xff]  ;;  %v270_v52 = vld [vmem:[#allocation8 + $0x8] sm:$0xff] }
  0x55   :  { %548 = vmatpush3.bf16.msra.mxu0 %v547_v14  ;;  %v190_v49 = vld [vmem:[#allocation7 + $0x78] sm:$0xff]  ;;  %v271_v53 = vld [vmem:[#allocation8 + $0x10] sm:$0xff]  ;;  %v589_v54 = vpack.c.bf16 %v270_v52, %v269_v51  ;;  %v273_v57 = vld [vmem:[#allocation8 + $0x20] sm:$0xff] }
  0x56   :  { %549 = vmatprep.subr.bf16.mxu0 %v746_v0  ;;  %v586_v50 = vpack.c.bf16 %v190_v49, %v189_v48  ;;  %v272_v55 = vld [vmem:[#allocation8 + $0x18] sm:$0xff]  ;;  %v274_v58 = vld [vmem:[#allocation8 + $0x28] sm:$0xff]  ;;  %v275_v60 = vld [vmem:[#allocation8 + $0x30] sm:$0xff] }
  0x57   :  { %572 = vmatpush3.bf16.msra.mxu1 %v571_v24  ;;  %v592_v56 = vpack.c.bf16 %v272_v55, %v271_v53  ;;  %v595_v59 = vpack.c.bf16 %v274_v58, %v273_v57  ;;  %v276_v61 = vld [vmem:[#allocation8 + $0x38] sm:$0xff]  ;;  %v277_v63 = vld [vmem:[#allocation8 + $0x40] sm:$0xff]  ;;  %v279_v3 = vld [vmem:[#allocation8 + $0x50] sm:$0xff] }
  0x58   :  { %573 = vmatprep.subr.bf16.mxu1 %v746_v0  ;;  %v598_v62 = vpack.c.bf16 %v276_v61, %v275_v60  ;;  %v280_v4 = vld [vmem:[#allocation8 + $0x58] sm:$0xff]  ;;  %v281_v6 = vld [vmem:[#allocation8 + $0x60] sm:$0xff]  ;;  %v282_v7 = vld [vmem:[#allocation8 + $0x68] sm:$0xff] }
  0x59   :  { %551 = vmatpush3.bf16.msra.mxu0 %v550_v21  ;;  %v604_v5 = vpack.c.bf16 %v280_v4, %v279_v3  ;;  %v607_v8 = vpack.c.bf16 %v282_v7, %v281_v6  ;;  %v381_v9 = vld [vmem:[%s900_s2] ss:$0 sm:$0xff]  ;;  %v283_v14 = vld [vmem:[#allocation8 + $0x70] sm:$0xff] }
  0x5a   :  { %552 = vmatprep.subr.bf16.mxu0 %v746_v0  ;;  %v284_v15 = vld [vmem:[#allocation8 + $0x78] sm:$0xff] }
  0x5b   :  { %575 = vmatpush3.bf16.msra.mxu1 %v574_v30  ;;  %v610_v16 = vpack.c.bf16 %v284_v15, %v283_v14  ;;  %v382_v17 = vld [vmem:[%s902_s4] ss:$0 sm:$0xff] }
  0x5c   :  { %576 = vmatprep.subr.bf16.mxu1 %v746_v0  ;;  %v383_v21 = vld [vmem:[%s904_s6] ss:$0 sm:$0xff] }
  0x5d   :  { %554 = vmatpush3.bf16.msra.mxu0 %v553_v27 }
  0x5e   :  { %555 = vmatprep.subr.bf16.mxu0 %v746_v0 }
  0x5f   :  { %578 = vmatpush3.bf16.msra.mxu1 %v577_v36 }
  0x60   :  { %579 = vmatprep.subr.bf16.mxu1 %v746_v0 }
  0x61   :  { %557 = vmatpush3.bf16.msra.mxu0 %v556_v33 }
  0x62   :  { %558 = vmatprep.subr.bf16.mxu0 %v746_v0 }
  0x63   :  { %581 = vmatpush3.bf16.msra.mxu1 %v580_v42 }
  0x64   :  { %582 = vmatprep.subr.bf16.mxu1 %v746_v0 }
  0x65   :  { %560 = vmatpush3.bf16.msra.mxu0 %v559_v39 }
  0x66   :  { %561 = vmatprep.subr.bf16.mxu0 %v746_v0 }
  0x67   :  { %584 = vmatpush3.bf16.msra.mxu1 %v583_v46 }
  0x68   :  { %585 = vmatprep.subr.bf16.mxu1 %v746_v0 }
  0x69   :  { %563 = vmatpush3.bf16.msra.mxu0 %v562_v45 }
  0x6a   :  { %588 = vmatprep.subr.bf16.mxu0 %v746_v0 }
  0x6b   :  { %587 = vmatpush3.bf16.msra.mxu1 %v586_v50 }
  0x6c   :  { %468 = vmatmul.mubr.f32.vlgmr.msra.gmra.mrb[0].mxu0 %v80_v47 }
  0x6d   :  { %537 = vmatprep.mubr.msk.f32.mxu0 %vm747_vm0, %v748_v1  ;;  %590 = vmatpush3.bf16.msra.mxu0 %v589_v54  ;;  %v278_v1 = vld [vmem:[#allocation8 + $0x48] sm:$0xff] }
  0x6e   :  { %591 = vmatprep.subr.bf16.mxu0 %v746_v0  ;;  %v601_v2 = vpack.c.bf16 %v278_v1, %v277_v63 }
  0x71   :  { %593 = vmatpush3.bf16.msra.mxu0 %v592_v56 }
  0x72   :  { %594 = vmatprep.subr.bf16.mxu0 %v746_v0 }
  0x75   :  { %596 = vmatpush3.bf16.msra.mxu0 %v595_v59 }
  0x76   :  { %597 = vmatprep.subr.bf16.mxu0 %v746_v0 }
  0x79   :  { %599 = vmatpush3.bf16.msra.mxu0 %v598_v62 }
  0x7a   :  { %600 = vmatprep.subr.bf16.mxu0 %v746_v0 }
  0x7d   :  { %602 = vmatpush3.bf16.msra.mxu0 %v601_v2 }
  0x7e   :  { %603 = vmatprep.subr.bf16.mxu0 %v746_v0 }
  0x81   :  { %605 = vmatpush3.bf16.msra.mxu0 %v604_v5 }
  0x82   :  { %606 = vmatprep.subr.bf16.mxu0 %v746_v0 }
  0x85   :  { %608 = vmatpush3.bf16.msra.mxu0 %v607_v8 }
  0x86   :  { %609 = vmatprep.subr.bf16.mxu0 %v746_v0 }
  0x89   :  { %611 = vmatpush3.bf16.msra.mxu0 %v610_v16 }
 0x13f   :  { %v170_v10 = vpop.f32.mrb[0].mxu0 }
 0x140   :  { %v171_v11 = vadd.f32 %v381_v9, %v170_v10  ;;  %v469_v12 = vpop.f32.mrb[1].mxu0 }
 0x142   :  { %v174_v13 = vmax.f32 %v171_v11, 0.0 }
 0x144   :  { %503 = vmatmul.mubr.f32.vlgmr.msra.gmra.mrb[0].mxu1 %v174_v13 }
 0x217   :  { %v264_v18 = vpop.f32.mrb[0].mxu1 }
 0x218   :  { %v265_v19 = vadd.f32 %v382_v17, %v264_v18  ;;  %v504_v0 = vpop.f32.mrb[1].mxu1 }
 0x21a   :  { %v268_v20 = vmax.f32 %v265_v19, 0.0 }
 0x21c   :  { %538 = vmatmul.mubr.f32.vlgmr.msra.gmra.mrb[2].mxu0 %v268_v20 }
 0x2ef   :  { %v358_v22 = vpop.f32.mrb[2].mxu0 }
 0x2f0   :  { %v359_v23 = vadd.f32 %v383_v21, %v358_v22  ;;  %v539_v24 = vpop.f32.mrb[3].mxu0 }
 0x2f2   :  { %v362_v25 = vmax.f32 %v359_v23, 0.0 }
 0x2f4   :  { %363 = vst [vmem:[#allocation10] sm:$0xff] %v362_v25 }
 0x2f5   :  { %721 = shalt.err (!%p718_p8)
}
 0x2f6   :  { %s722_s9 = scalar_lea.hbm %s905_s7, 128 }
 0x2f7   :  { %p723_p9 = scmp.ne.s32.totalorder %s905_s7, %s722_s9  ;;  %p726_p10 = scmp.lt.u32.totalorder %s722_s9, %s905_s7 }
 0x2f9   :  { %p728_p11 = pnand %p726_p10, %p723_p9 }
 0x2fb   :  { %731 = shalt.err (!%p728_p11)
}
 0x2fc   :  { %373 = dma.vmem_to_hbm [thread:$0]  %s371_s29, 128, %s905_s7, [#allocation4]  }
 0x2fd   :  { %738 = dma.done.wait [#allocation4], 128  }
 0x2fe   :  { %739 = vsyncadd [#allocation4], 4294967168 }
 0x2ff   :  { %377 = vsyncpa [#allocation3], 1 }
 0x300   :  { %378 = vsyncpa [#allocation6], 1 }
 0x301   :  { %379 = vsyncpa [#allocation9], 1 }
 0x302   :  { %380 = vsyncpa [#allocation4], 1 }

</bundles_post_ra>
